<compile_context>
chip_gen: v7x
topology: tpu7x:2x2x1
jax: 0.10.0
libtpu: 0.0.40
codegen_flags: <defaults>
</compile_context>

<pallas_src>
import functools

import jax
import jax.numpy as jnp
import numpy as np
from jax.experimental import pallas as pl
from jax.experimental.pallas import tpu as pltpu


def _round_up(a, b):
    return ((a + b - 1) // b) * b


def _swag_kernel(x_ref, rhs_ref, cd_ref, const_ref, mu_ref, unc_ref,
                 acc_ref, dacc_ref, *, S):
    """Grid = (N blocks, D-reduction blocks).

    x_ref     : (TN, TK)    bf16   input tile
    rhs_ref   : (TK, S_tot) bf16   [cov_factor[:D] | W | 0-pad] tile
    cd_ref    : (1, TK)     f32    cov_diag[:D] tile
    const_ref : (1, S_tot)  f32    [cov_factor bias row | b | cov_diag bias | 0]
    mu_ref    : (TN, 1)     f32    model output
    unc_ref   : (TN, 1)     f32    sqrt(low_rank + diag)
    acc_ref   : (TN, S_tot) f32    running x @ RHS
    dacc_ref  : (TN, 1)     f32    running sum(x^2 * cov_diag[:D])
    """
    k = pl.program_id(1)

    @pl.when(k == 0)
    def _init():
        acc_ref[...] = jnp.zeros_like(acc_ref)
        dacc_ref[...] = jnp.zeros_like(dacc_ref)

    x_bf = x_ref[...]                                           # (TN, TK) bf16
    # Fused MXU sweep: cols [0:S) -> x @ cov_factor[:D], col S -> x @ W.
    acc_ref[...] += jnp.dot(x_bf, rhs_ref[...],
                            preferred_element_type=jnp.float32)
    # Diag partial sum in f32 on the VPU/XLU (v5e has no bf16 VPU).
    x_f = x_bf.astype(jnp.float32)
    dacc_ref[...] += jnp.sum(x_f * x_f * cd_ref[...], axis=1, keepdims=True)

    @pl.when(k == pl.num_programs(1) - 1)
    def _finalize():
        const = const_ref[...]                                  # (1, S_tot)
        full = acc_ref[...] + const                             # bias correction
        mu_ref[...] = full[:, S:S + 1]                          # x @ W + b
        col = jax.lax.broadcasted_iota(jnp.int32, full.shape, 1)
        low_rank = jnp.sum(jnp.where(col < S, full * full, 0.0),
                           axis=1, keepdims=True)               # (TN, 1)
        diag = dacc_ref[...] + const[:, S + 1:S + 2]            # + cov_diag[D]
        unc_ref[...] = jnp.sqrt(low_rank + diag)                # EUP, once per N block


def swag_forward(inputs, mean, cov_factor, cov_diag, configured=True,
                 tn=512, tk=1024):
    """Mirrors SWAG.forward: returns (mu (N,1) f32, unc (N,) f32)."""
    if not configured:
        print('Must call process_dataset first before using model for predictions.')
        raise NotImplementedError

    N = inputs.shape[0]
    x = inputs.reshape(N, -1)
    D = x.shape[1]
    P = mean.shape[0]
    S = cov_factor.shape[1]
    assert P == D + 1, "n_params must equal D (weights) + 1 (bias)"

    TN = min(tn, _round_up(N, 8))
    TK = min(tk, _round_up(D, 128))
    N_pad = _round_up(N, TN)
    D_pad = _round_up(D, TK)
    S_tot = _round_up(S + 2, 128)        # lane-dense: cov cols + W col + cd-bias slot

    # RHS = [cov_factor[:D] | W | 0-pad], streamed in (TK, S_tot) bf16 blocks.
    rhs = jnp.zeros((D_pad, S_tot), jnp.float32)
    rhs = rhs.at[:D, :S].set(cov_factor[:D].astype(jnp.float32))
    rhs = rhs.at[:D, S].set(mean[:D].astype(jnp.float32))
    rhs = rhs.astype(jnp.bfloat16)

    # Constants row: bias row of cov_factor, model bias b, cov_diag bias element.
    const = jnp.zeros((1, S_tot), jnp.float32)
    const = const.at[0, :S].set(cov_factor[D].astype(jnp.float32))
    const = const.at[0, S].set(mean[D].astype(jnp.float32))
    const = const.at[0, S + 1].set(cov_diag[D].astype(jnp.float32))

    cd = jnp.zeros((1, D_pad), jnp.float32)
    cd = cd.at[0, :D].set(cov_diag[:D].astype(jnp.float32))

    xb = x.astype(jnp.bfloat16)
    if (N_pad != N) or (D_pad != D):
        xb = jnp.pad(xb, ((0, N_pad - N), (0, D_pad - D)))

    kernel = functools.partial(_swag_kernel, S=S)
    mu, unc = pl.pallas_call(
        kernel,
        out_shape=(jax.ShapeDtypeStruct((N_pad, 1), jnp.float32),
                   jax.ShapeDtypeStruct((N_pad, 1), jnp.float32)),
        grid_spec=pltpu.PrefetchScalarGridSpec(
            num_scalar_prefetch=0,
            grid=(N_pad // TN, D_pad // TK),      # reduction axis last
            in_specs=[
                pl.BlockSpec((TN, TK), lambda i, k: (i, k)),       # x
                pl.BlockSpec((TK, S_tot), lambda i, k: (k, 0)),    # RHS
                pl.BlockSpec((1, TK), lambda i, k: (0, k)),        # cov_diag[:D]
                pl.BlockSpec((1, S_tot), lambda i, k: (0, 0)),     # constants row
            ],
            out_specs=(pl.BlockSpec((TN, 1), lambda i, k: (i, 0)),
                       pl.BlockSpec((TN, 1), lambda i, k: (i, 0))),
            scratch_shapes=[pltpu.VMEM((TN, S_tot), jnp.float32),
                            pltpu.VMEM((TN, 1), jnp.float32)]),
        compiler_params=pltpu.CompilerParams(
            dimension_semantics=("parallel", "arbitrary")),
    )(xb, rhs, cd, const)

    return mu[:N], unc[:N, 0]


if __name__ == "__main__":
    key = jax.random.PRNGKey(0)
    N, C, H, Wd = 4, 4, 16, 16          # batch, channels, spatial
    D = C * H * Wd                      # flattened feature dim (1024)
    P = D + 1                           # n_params of wrapped linear model
    S = 16                              # num_samples (small test value; default 150)

    kx, km, kd, kf = jax.random.split(key, 4)
    x = jax.random.normal(kx, (N, C, H, Wd), jnp.float32)

    # Deterministic synthetic SWAG statistics (what process_dataset would fill).
    mean = jax.random.normal(km, (P,), jnp.float32) * 0.1
    cov_diag = jnp.abs(jax.random.normal(kd, (P,), jnp.float32)) * 0.01
    Dmat = jax.random.normal(kf, (P, S), jnp.float32) * 0.1
    cov_factor = Dmat / (np.sqrt(S - 1) * np.sqrt(2.0))

    mu, unc = swag_forward(x, mean, cov_factor, cov_diag, configured=True)
    jax.block_until_ready((mu, unc))

    # --- Reference 1: matched precision (bf16-rounded x / W / cov_factor). ---
    xb32 = x.reshape(N, D).astype(jnp.bfloat16).astype(jnp.float32)
    Wb = mean[:D].astype(jnp.bfloat16).astype(jnp.float32)
    cfb = cov_factor[:D].astype(jnp.bfloat16).astype(jnp.float32)
    mu_m = xb32 @ Wb + mean[D]
    gf_m = xb32 @ cfb + cov_factor[D][None, :]
    low_m = jnp.sum(gf_m ** 2, axis=1)
    diag_m = jnp.sum(xb32 * xb32 * cov_diag[None, :D], axis=1) + cov_diag[D]
    unc_m = jnp.sqrt(low_m + diag_m)

    # --- Reference 2: pure f32 SWAG semantics (loose tolerance, bf16 stream). ---
    xf = x.reshape(N, D)
    G = jnp.concatenate([xf, jnp.ones((N, 1), jnp.float32)], axis=1)
    mu_f = G @ mean.reshape(P, 1)
    low_f = jnp.sum((G @ cov_factor) ** 2, axis=1)
    diag_f = jnp.sum(G * G * cov_diag[None, :], axis=1)
    unc_f = jnp.sqrt(low_f + diag_f)

    assert mu.shape == (N, 1) and unc.shape == (N,)
    assert np.allclose(np.asarray(mu[:, 0]), np.asarray(mu_m), rtol=2e-3, atol=2e-3)
    assert np.allclose(np.asarray(unc), np.asarray(unc_m), rtol=2e-3, atol=2e-3)
    assert np.allclose(np.asarray(mu), np.asarray(mu_f), rtol=5e-2, atol=5e-2)
    assert np.allclose(np.asarray(unc), np.asarray(unc_f), rtol=5e-2, atol=5e-2)
    print("KERNEL_OK")
</pallas_src>

<mosaic_0001>
module attributes {stable_mosaic.version = 11 : i64} {
  func.func @_swag_kernel(%arg0: i32, %arg1: i32, %arg2: memref<8x1024xbf16, #tpu.memory_space<vmem>>, %arg3: memref<1024x128xbf16, #tpu.memory_space<vmem>>, %arg4: memref<1x1024xf32, #tpu.memory_space<vmem>>, %arg5: memref<1x128xf32, #tpu.memory_space<vmem>>, %arg6: memref<8x1xf32, #tpu.memory_space<vmem>>, %arg7: memref<8x1xf32, #tpu.memory_space<vmem>>, %arg8: memref<8x128xf32, #tpu.memory_space<vmem>>, %arg9: memref<8x1xf32, #tpu.memory_space<vmem>>) attributes {dimension_semantics = [#tpu.dimension_semantics<parallel>, #tpu.dimension_semantics<arbitrary>], iteration_bounds = array<i64: 1, 1>, scalar_prefetch = 0 : i64, scratch_operands = 2 : i64, tpu.core_type = #tpu.core_type<tc>, window_params = [{transform_indices = @transform_0, window_bounds = array<i64: 8, 1024>}, {transform_indices = @transform_1, window_bounds = array<i64: 1024, 128>}, {transform_indices = @transform_2, window_bounds = array<i64: 1, 1024>}, {pipeline_mode = #tpu.pipeline_mode<synchronous>, transform_indices = @transform_3, window_bounds = array<i64: 1, 128>}, {transform_indices = @transform_4, window_bounds = array<i64: 8, 1>}, {transform_indices = @transform_5, window_bounds = array<i64: 8, 1>}]} {
    %c0_i32 = arith.constant 0 : i32
    %0 = arith.cmpi eq, %arg1, %c0_i32 : i32
    %1 = arith.extui %0 : i1 to i32
    %c0_i32_0 = arith.constant 0 : i32
    %2 = arith.cmpi ne, %1, %c0_i32_0 : i32
    scf.if %2 {
      %cst_17 = arith.constant 0.000000e+00 : f32
      %22 = vector.broadcast %cst_17 : f32 to vector<8x128xf32>
      %c0_18 = arith.constant 0 : index
      %c0_19 = arith.constant 0 : index
      %23 = vector.load %arg8[%c0_18, %c0_19] : memref<8x128xf32, #tpu.memory_space<vmem>>, vector<8x128xf32>
      tpu.vector_store %arg8[%c0_18, %c0_19], %22 {strides = array<i32>} : memref<8x128xf32, #tpu.memory_space<vmem>>, vector<8x128xf32>,
      %cst_20 = arith.constant 0.000000e+00 : f32
      %24 = vector.broadcast %cst_20 : f32 to vector<8x1xf32>
      %c0_21 = arith.constant 0 : index
      %c0_22 = arith.constant 0 : index
      %25 = vector.load %arg9[%c0_21, %c0_22] : memref<8x1xf32, #tpu.memory_space<vmem>>, vector<8x1xf32>
      tpu.vector_store %arg9[%c0_21, %c0_22], %24 {strides = array<i32>} : memref<8x1xf32, #tpu.memory_space<vmem>>, vector<8x1xf32>,
    } else {
    }
    %c0 = arith.constant 0 : index
    %c0_1 = arith.constant 0 : index
    %3 = vector.load %arg2[%c0, %c0_1] : memref<8x1024xbf16, #tpu.memory_space<vmem>>, vector<8x1024xbf16>
    %c0_2 = arith.constant 0 : index
    %c0_3 = arith.constant 0 : index
    %4 = vector.load %arg8[%c0_2, %c0_3] : memref<8x128xf32, #tpu.memory_space<vmem>>, vector<8x128xf32>
    %c0_4 = arith.constant 0 : index
    %c0_5 = arith.constant 0 : index
    %5 = vector.load %arg3[%c0_4, %c0_5] : memref<1024x128xbf16, #tpu.memory_space<vmem>>, vector<1024x128xbf16>
    %cst = arith.constant dense<0.000000e+00> : vector<8x128xf32>
    %6 = tpu.matmul %3, %5, %cst {dimension_numbers = #tpu.dot_dimension_numbers<[1], [0], [0], [1], [0, 0, 1, 1], [], []>} : vector<8x1024xbf16>, vector<1024x128xbf16>, vector<8x128xf32> -> vector<8x128xf32>
    %7 = arith.addf %4, %6 : vector<8x128xf32>
    %c0_6 = arith.constant 0 : index
    %c0_7 = arith.constant 0 : index
    %8 = vector.load %arg8[%c0_6, %c0_7] : memref<8x128xf32, #tpu.memory_space<vmem>>, vector<8x128xf32>
    tpu.vector_store %arg8[%c0_6, %c0_7], %7 {strides = array<i32>} : memref<8x128xf32, #tpu.memory_space<vmem>>, vector<8x128xf32>,
    %9 = arith.extf %3 : vector<8x1024xbf16> to vector<8x1024xf32>
    %c0_8 = arith.constant 0 : index
    %c0_9 = arith.constant 0 : index
    %10 = vector.load %arg9[%c0_8, %c0_9] : memref<8x1xf32, #tpu.memory_space<vmem>>, vector<8x1xf32>
    %11 = arith.mulf %9, %9 : vector<8x1024xf32>
    %c0_10 = arith.constant 0 : index
    %c0_11 = arith.constant 0 : index
    %12 = vector.load %arg4[%c0_10, %c0_11] : memref<1x1024xf32, #tpu.memory_space<vmem>>, vector<1x1024xf32>
    %13 = vector.broadcast %12 : vector<1x1024xf32> to vector<8x1024xf32>
    %14 = arith.mulf %11, %13 : vector<8x1024xf32>
    %cst_12 = arith.constant dense<0.000000e+00> : vector<8xf32>
    %15 = vector.multi_reduction <add>, %14, %cst_12 [1] : vector<8x1024xf32> to vector<8xf32>
    %16 = vector.shape_cast %15 : vector<8xf32> to vector<8x1xf32>
    %17 = arith.addf %10, %16 : vector<8x1xf32>
    %c0_13 = arith.constant 0 : index
    %c0_14 = arith.constant 0 : index
    %18 = vector.load %arg9[%c0_13, %c0_14] : memref<8x1xf32, #tpu.memory_space<vmem>>, vector<8x1xf32>
    tpu.vector_store %arg9[%c0_13, %c0_14], %17 {strides = array<i32>} : memref<8x1xf32, #tpu.memory_space<vmem>>, vector<8x1xf32>,
    %c0_i32_15 = arith.constant 0 : i32
    %19 = arith.cmpi eq, %arg1, %c0_i32_15 : i32
    %20 = arith.extui %19 : i1 to i32
    %c0_i32_16 = arith.constant 0 : i32
    %21 = arith.cmpi ne, %20, %c0_i32_16 : i32
    scf.if %21 {
      %c0_17 = arith.constant 0 : index
      %c0_18 = arith.constant 0 : index
      %22 = vector.load %arg5[%c0_17, %c0_18] : memref<1x128xf32, #tpu.memory_space<vmem>>, vector<1x128xf32>
      %c0_19 = arith.constant 0 : index
      %c0_20 = arith.constant 0 : index
      %23 = vector.load %arg8[%c0_19, %c0_20] : memref<8x128xf32, #tpu.memory_space<vmem>>, vector<8x128xf32>
      %24 = vector.broadcast %22 : vector<1x128xf32> to vector<8x128xf32>
      %25 = arith.addf %23, %24 : vector<8x128xf32>
      %26 = vector.extract_strided_slice %25 {offsets = [0, 16], sizes = [8, 1], strides = [1, 1]} : vector<8x128xf32> to vector<8x1xf32>
      %c0_21 = arith.constant 0 : index
      %c0_22 = arith.constant 0 : index
      %27 = vector.load %arg6[%c0_21, %c0_22] : memref<8x1xf32, #tpu.memory_space<vmem>>, vector<8x1xf32>
      tpu.vector_store %arg6[%c0_21, %c0_22], %26 {strides = array<i32>} : memref<8x1xf32, #tpu.memory_space<vmem>>, vector<8x1xf32>,
      %28 = tpu.iota {dimensions = array<i32: 1>} : vector<8x128xi32>
      %c16_i32 = arith.constant 16 : i32
      %29 = vector.broadcast %c16_i32 : i32 to vector<8x128xi32>
      %30 = arith.cmpi slt, %28, %29 : vector<8x128xi32>
      %31 = arith.mulf %25, %25 : vector<8x128xf32>
      %cst_23 = arith.constant 0.000000e+00 : f32
      %32 = vector.broadcast %cst_23 : f32 to vector<8x128xf32>
      %33 = arith.select %30, %31, %32 : vector<8x128xi1>, vector<8x128xf32>
      %cst_24 = arith.constant dense<0.000000e+00> : vector<8xf32>
      %34 = vector.multi_reduction <add>, %33, %cst_24 [1] : vector<8x128xf32> to vector<8xf32>
      %35 = vector.shape_cast %34 : vector<8xf32> to vector<8x1xf32>
      %c0_25 = arith.constant 0 : index
      %c0_26 = arith.constant 0 : index
      %36 = vector.load %arg9[%c0_25, %c0_26] : memref<8x1xf32, #tpu.memory_space<vmem>>, vector<8x1xf32>
      %37 = vector.extract_strided_slice %22 {offsets = [0, 17], sizes = [1, 1], strides = [1, 1]} : vector<1x128xf32> to vector<1x1xf32>
      %38 = vector.broadcast %37 : vector<1x1xf32> to vector<8x1xf32>
      %39 = arith.addf %36, %38 : vector<8x1xf32>
      %40 = arith.addf %35, %39 : vector<8x1xf32>
      %41 = math.sqrt %40 : vector<8x1xf32>
      %c0_27 = arith.constant 0 : index
      %c0_28 = arith.constant 0 : index
      %42 = vector.load %arg7[%c0_27, %c0_28] : memref<8x1xf32, #tpu.memory_space<vmem>>, vector<8x1xf32>
      tpu.vector_store %arg7[%c0_27, %c0_28], %41 {strides = array<i32>} : memref<8x1xf32, #tpu.memory_space<vmem>>, vector<8x1xf32>,
    } else {
    }
    return
  }
  func.func @transform_0(%arg0: i32, %arg1: i32) -> (i32, i32) {
    %c0_i32 = arith.constant 0 : i32
    return %arg0, %arg1 : i32, i32
  }
  func.func @transform_1(%arg0: i32, %arg1: i32) -> (i32, i32) {
    %c0_i32 = arith.constant 0 : i32
    %c0_i32_0 = arith.constant 0 : i32
    return %arg1, %c0_i32 : i32, i32
  }
  func.func @transform_2(%arg0: i32, %arg1: i32) -> (i32, i32) {
    %c0_i32 = arith.constant 0 : i32
    %c0_i32_0 = arith.constant 0 : i32
    return %c0_i32, %arg1 : i32, i32
  }
  func.func @transform_3(%arg0: i32, %arg1: i32) -> (i32, i32) {
    %c0_i32 = arith.constant 0 : i32
    %c0_i32_0 = arith.constant 0 : i32
    %c0_i32_1 = arith.constant 0 : i32
    return %c0_i32, %c0_i32_0 : i32, i32
  }
  func.func @transform_4(%arg0: i32, %arg1: i32) -> (i32, i32) {
    %c0_i32 = arith.constant 0 : i32
    %c0_i32_0 = arith.constant 0 : i32
    return %arg0, %c0_i32 : i32, i32
  }
  func.func @transform_5(%arg0: i32, %arg1: i32) -> (i32, i32) {
    %c0_i32 = arith.constant 0 : i32
    %c0_i32_0 = arith.constant 0 : i32
    return %arg0, %c0_i32 : i32, i32
  }
}

</mosaic_0001>

<bundles_post_ra>
// kernel: tpu_custom_call.1
= control target key start
LH: loop header
LB: loop body
LE: loop exit
PB: predicated region body
PF: predicated region fallthrough
CT: control target
= control target key end

     0   :  { %11 = vsyncpa [#allocation5], 0  ;;  %s1316_s0 = inlined_call_operand.hbm [shape: bf16[8,1024], index: 0, kind: input, shape index: {}]   ;;  %s1317_s1 = inlined_call_operand.hbm [shape: bf16[1024,128], index: 1, kind: input, shape index: {}]   ;;  %s1318_s2 = inlined_call_operand.hbm [shape: f32[1,1024], index: 2, kind: input, shape index: {}]   ;;  %s1319_s3 = inlined_call_operand.vmem [shape: f32[1,128], index: 3, kind: input, shape index: {}]   ;;  %s1320_s4 = inlined_call_operand.vmem [shape: f32[8,1], index: 4, kind: output, shape index: {0}]   ;;  %s1321_s5 = inlined_call_operand.vmem [shape: f32[8,1], index: 5, kind: output, shape index: {1}]  }
   0x1   :  { %12 = vsyncpa [#allocation7], 0  ;;  %s1211_s18 = smov [#allocation6]   ;;  %s1141_s22 = scalar_lea.hbm %s1317_s1, 8192 }
   0x2   :  { %s28_s19 = sshll.u32 %s1211_s18, 4  ;;  %p1142_p0 = scmp.ne.s32.totalorder %s1317_s1, %s1141_s22  ;;  %s29_s19 = int_to_ptr.vmem [resolvable:$true] %s28_s19 }
   0x3   :  { %p1145_p1 = scmp.lt.u32.totalorder %s1141_s22, %s1317_s1 }
   0x5   :  { %p1147_p2 = pnand %p1145_p1, %p1142_p0 }
   0x7   :  { %1150 = shalt.err (!%p1147_p2)
}
   0x8   :  { %s1151_s27 = scalar_lea.vmem %s29_s19, 8192  ;;  %p1156_p4 = scmp.lt.s32.totalorder %s29_s19, %s29_s19 }
   0x9   :  { %p1152_p3 = scmp.ne.s32.totalorder %s29_s19, %s1151_s27  ;;  %p1157_p5 = scmp.lt.s32.totalorder %s1151_s27, %s1151_s27 }
   0xb   :  { %p1158_p6 = por %p1157_p5, %p1156_p4 }
   0xd   :  { %p1159_p7 = pnand %p1158_p6, %p1152_p3 }
   0xf   :  { %1162 = shalt.err (!%p1159_p7)
}
  0x10   :  { %s1212_s28 = smov 64   ;;  %s1213_s29 = smov 4  }
  0x11   :  { %34 = dma.hbm_to_vmem [thread:$0]  %s1317_s1, 8192, %s29_s19, [#allocation7], %s1212_s28, %s1212_s28, %s1213_s29  }
  0x12   :  { %s1214_s7 = smov [#allocation4]   ;;  %s1215_s9 = smov [#allocation8]  }
  0x13   :  { %s19_s8 = sshll.u32 %s1214_s7, 4  ;;  %s41_s10 = sshll.u32 %s1215_s9, 4  ;;  %s20_s8 = int_to_ptr.vmem [resolvable:$true] %s19_s8  ;;  %s42_s10 = int_to_ptr.vmem [resolvable:$true] %s41_s10 }
  0x14   :  { %s1163_s13 = scalar_lea.hbm %s1316_s0, 512 }
  0x15   :  { %p1164_p8 = scmp.ne.s32.totalorder %s1316_s0, %s1163_s13  ;;  %p1167_p9 = scmp.lt.u32.totalorder %s1163_s13, %s1316_s0 }
  0x17   :  { %p1169_p10 = pnand %p1167_p9, %p1164_p8 }
  0x19   :  { %1172 = shalt.err (!%p1169_p10)
}
  0x1a   :  { %s1173_s1 = scalar_lea.vmem %s20_s8, 512  ;;  %p1178_p12 = scmp.lt.s32.totalorder %s20_s8, %s20_s8 }
  0x1b   :  { %p1174_p11 = scmp.ne.s32.totalorder %s20_s8, %s1173_s1  ;;  %p1179_p13 = scmp.lt.s32.totalorder %s1173_s1, %s1173_s1 }
  0x1d   :  { %p1180_p0 = por %p1179_p13, %p1178_p12 }
  0x1f   :  { %p1181_p1 = pnand %p1180_p0, %p1174_p11 }
  0x21   :  { %1184 = shalt.err (!%p1181_p1)
}
  0x22   :  { %22 = dma.hbm_to_vmem [thread:$0]  %s1316_s0, 512, %s20_s8, [#allocation5]  }
  0x23   :  { %s1185_s22 = scalar_lea.hbm %s1318_s2, 128 }
  0x24   :  { %p1186_p2 = scmp.ne.s32.totalorder %s1318_s2, %s1185_s22  ;;  %p1189_p3 = scmp.lt.u32.totalorder %s1185_s22, %s1318_s2 }
  0x26   :  { %p1191_p4 = pnand %p1189_p3, %p1186_p2 }
  0x28   :  { %1194 = shalt.err (!%p1191_p4)
}
  0x29   :  { %s1195_s27 = scalar_lea.vmem %s42_s10, 128  ;;  %p1200_p6 = scmp.lt.s32.totalorder %s42_s10, %s42_s10 }
  0x2a   :  { %p1196_p5 = scmp.ne.s32.totalorder %s42_s10, %s1195_s27  ;;  %p1201_p7 = scmp.lt.s32.totalorder %s1195_s27, %s1195_s27 }
  0x2c   :  { %p1202_p8 = por %p1201_p7, %p1200_p6 }
  0x2e   :  { %p1203_p9 = pnand %p1202_p8, %p1196_p5 }
  0x30   :  { %1206 = shalt.err (!%p1203_p9)
}
  0x31   :  { %44 = dma.hbm_to_vmem [thread:$0]  %s1318_s2, 128, %s42_s10, [#allocation7]  }
  0x32   :  { %1207 = dma.done.wait [#allocation5], 512  }
  0x33   :  { %1208 = vsyncadd [#allocation5], 4294966784 }
  0x34   :  { %1209 = dma.done.wait [#allocation7], 8320  }
  0x35   :  { %1210 = vsyncadd [#allocation7], 4294958976  ;;  %v1067_v0 = vld [vmem:[#allocation6 + $0x40] sm:$0xff]   ;;  %v1071_v4 = vld [vmem:[#allocation6 + $0x48] sm:$0xff]   ;;  %s1216_s30 = smov 111   ;;  %vm62_vm0 = vcmask 7168  }
  0x36   :  { %v1068_v1 = vld [vmem:[#allocation6 + $0xc0] sm:$0xff]   ;;  %971 = vmatprep.subr.bf16.mxu0 %v1067_v0  ;;  %v1072_v5 = vld [vmem:[#allocation6 + $0xc8] sm:$0xff]   ;;  %v1075_v8 = vld [vmem:[#allocation6 + $0x50] sm:$0xff]  }
  0x37   :  { %v1069_v2 = vld [vmem:[#allocation6] sm:$0xff]   ;;  %993 = vmatprep.subr.bf16.mxu1 %v1068_v1  ;;  %v1073_v6 = vld [vmem:[#allocation6 + $0x8] sm:$0xff]   ;;  %v1076_v9 = vld [vmem:[#allocation6 + $0xd0] sm:$0xff]  }
  0x38   :  { %v1070_v3 = vld [vmem:[#allocation6 + $0x80] sm:$0xff]   ;;  %972 = vmatpush3.bf16.msra.mxu0 %v1069_v2  ;;  %v1074_v7 = vld [vmem:[#allocation6 + $0x88] sm:$0xff]   ;;  %v1077_v10 = vld [vmem:[#allocation6 + $0x10] sm:$0xff]  }
  0x39   :  { %994 = vmatpush3.bf16.msra.mxu1 %v1070_v3  ;;  %973 = vmatprep.subr.bf16.mxu0 %v1071_v4  ;;  %v1078_v11 = vld [vmem:[#allocation6 + $0x90] sm:$0xff]   ;;  %v1079_v12 = vld [vmem:[#allocation6 + $0x58] sm:$0xff]   ;;  %v1083_v16 = vld [vmem:[#allocation6 + $0x60] sm:$0xff]  }
  0x3a   :  { %995 = vmatprep.subr.bf16.mxu1 %v1072_v5  ;;  %v1080_v13 = vld [vmem:[#allocation6 + $0xd8] sm:$0xff]   ;;  %v1084_v17 = vld [vmem:[#allocation6 + $0xe0] sm:$0xff]   ;;  %v1087_v20 = vld [vmem:[#allocation6 + $0x68] sm:$0xff]  }
  0x3b   :  { %v1081_v14 = vld [vmem:[#allocation6 + $0x18] sm:$0xff]   ;;  %v1085_v18 = vld [vmem:[#allocation6 + $0x20] sm:$0xff]   ;;  %v1088_v21 = vld [vmem:[#allocation6 + $0xe8] sm:$0xff]  }
  0x3c   :  { %974 = vmatpush3.bf16.msra.mxu0 %v1073_v6  ;;  %v1082_v15 = vld [vmem:[#allocation6 + $0x98] sm:$0xff]   ;;  %v1086_v19 = vld [vmem:[#allocation6 + $0xa0] sm:$0xff]   ;;  %v1089_v22 = vld [vmem:[#allocation6 + $0x28] sm:$0xff]  }
  0x3d   :  { %996 = vmatpush3.bf16.msra.mxu1 %v1074_v7  ;;  %975 = vmatprep.subr.bf16.mxu0 %v1075_v8  ;;  %v1090_v23 = vld [vmem:[#allocation6 + $0xa8] sm:$0xff]   ;;  %v1091_v24 = vld [vmem:[#allocation6 + $0x70] sm:$0xff]   ;;  %v1095_v28 = vld [vmem:[#allocation6 + $0x78] sm:$0xff]  }
  0x3e   :  { %997 = vmatprep.subr.bf16.mxu1 %v1076_v9  ;;  %v1092_v25 = vld [vmem:[#allocation6 + $0xf0] sm:$0xff]   ;;  %v1096_v29 = vld [vmem:[#allocation6 + $0xf8] sm:$0xff]   ;;  %v1285_v32 = vld [vmem:[#allocation4] sm:$0xff] }
  0x3f   :  { %v1093_v26 = vld [vmem:[#allocation6 + $0x30] sm:$0xff]   ;;  %v1097_v30 = vld [vmem:[#allocation6 + $0x38] sm:$0xff]   ;;  %v1287_v33 = vld [vmem:[#allocation4 + $0x8] sm:$0xff]  ;;  %v899_v34 = vcombine.high %v1285_v32, %v1285_v32  ;;  %v898_v38 = vcombine.low %v1285_v32, %v1285_v32 }
  0x40   :  { %976 = vmatpush3.bf16.msra.mxu0 %v1077_v10  ;;  %v1094_v27 = vld [vmem:[#allocation6 + $0xb0] sm:$0xff]   ;;  %v1098_v31 = vld [vmem:[#allocation6 + $0xb8] sm:$0xff]   ;;  %v1103_v35 = vld [vmem:[#allocation6 + $0x140] sm:$0xff]   ;;  %v901_v36 = vcombine.high %v1287_v33, %v1287_v33  ;;  %v900_v40 = vcombine.low %v1287_v33, %v1287_v33 }
  0x41   :  { %998 = vmatpush3.bf16.msra.mxu1 %v1078_v11  ;;  %977 = vmatprep.subr.bf16.mxu0 %v1079_v12  ;;  %v1104_v37 = vld [vmem:[#allocation6 + $0x1c0] sm:$0xff]   ;;  %v1107_v42 = vld [vmem:[#allocation6 + $0x148] sm:$0xff]   ;;  %v1111_v46 = vld [vmem:[#allocation6 + $0x150] sm:$0xff]   ;;  %v790_v12 = vlaneseq }
  0x42   :  { %999 = vmatprep.subr.bf16.mxu1 %v1080_v13  ;;  %641 = vmatprep.mubr.bf16.mxu0 %v899_v34  ;;  %v1105_v39 = vld [vmem:[#allocation6 + $0x100] sm:$0xff]   ;;  %v1108_v43 = vld [vmem:[#allocation6 + $0x1c8] sm:$0xff]   ;;  %v1112_v47 = vld [vmem:[#allocation6 + $0x1d0] sm:$0xff]  }
  0x43   :  { %681 = vmatprep.mubr.bf16.mxu1 %v901_v36  ;;  %v1106_v41 = vld [vmem:[#allocation6 + $0x180] sm:$0xff]   ;;  %v1109_v44 = vld [vmem:[#allocation6 + $0x108] sm:$0xff]   ;;  %v1113_v48 = vld [vmem:[#allocation6 + $0x110] sm:$0xff]   ;;  %v791_v13 = vshrl.u32 %v790_v12, 7 }
  0x44   :  { %978 = vmatpush3.bf16.msra.mxu0 %v1081_v14  ;;  %v1110_v45 = vld [vmem:[#allocation6 + $0x188] sm:$0xff]   ;;  %v1114_v49 = vld [vmem:[#allocation6 + $0x190] sm:$0xff]   ;;  %v1115_v50 = vld [vmem:[#allocation6 + $0x158] sm:$0xff]   ;;  %v771_v14 = vunpack.c.l.bf16 %v1285_v32 }
  0x45   :  { %1000 = vmatpush3.bf16.msra.mxu1 %v1082_v15  ;;  %979 = vmatprep.subr.bf16.mxu0 %v1083_v16  ;;  %v1116_v51 = vld [vmem:[#allocation6 + $0x1d8] sm:$0xff]   ;;  %v1119_v54 = vld [vmem:[#allocation6 + $0x160] sm:$0xff]   ;;  %v1123_v58 = vld [vmem:[#allocation6 + $0x168] sm:$0xff]   ;;  %v772_v15 = vunpack.c.h.bf16 %v1285_v32  ;;  %v792_v16 = vsub.s32 0, %v791_v13  ;;  %v808_v36 = vsub.s32 4, %v791_v13 }
  0x46   :  { %1001 = vmatprep.subr.bf16.mxu1 %v1084_v17  ;;  %v1117_v52 = vld [vmem:[#allocation6 + $0x118] sm:$0xff]   ;;  %v1120_v55 = vld [vmem:[#allocation6 + $0x1e0] sm:$0xff]   ;;  %v1124_v59 = vld [vmem:[#allocation6 + $0x1e8] sm:$0xff]   ;;  %v796_v17 = vsub.s32 1, %v791_v13 }
  0x47   :  { %v1118_v53 = vld [vmem:[#allocation6 + $0x198] sm:$0xff]   ;;  %v1121_v56 = vld [vmem:[#allocation6 + $0x120] sm:$0xff]   ;;  %v1125_v60 = vld [vmem:[#allocation6 + $0x128] sm:$0xff]  }
  0x48   :  { %980 = vmatpush3.bf16.msra.mxu0 %v1085_v18  ;;  %v1122_v57 = vld [vmem:[#allocation6 + $0x1a0] sm:$0xff]   ;;  %v1126_v61 = vld [vmem:[#allocation6 + $0x1a8] sm:$0xff]   ;;  %v1127_v62 = vld [vmem:[#allocation6 + $0x170] sm:$0xff]  }
  0x49   :  { %1002 = vmatpush3.bf16.msra.mxu1 %v1086_v19  ;;  %981 = vmatprep.subr.bf16.mxu0 %v1087_v20  ;;  %v1128_v63 = vld [vmem:[#allocation6 + $0x1f0] sm:$0xff]   ;;  %v1131_v2 = vld [vmem:[#allocation6 + $0x178] sm:$0xff]   ;;  %v788_v18 = vld [vmem:[#allocation8] sm:$0xff]  ;;  %v773_v19 = vunpack.c.l.bf16 %v1287_v33  ;;  %v800_v20 = vsub.s32 2, %v791_v13 }
  0x4a   :  { %1003 = vmatprep.subr.bf16.mxu1 %v1088_v21  ;;  %v1129_v0 = vld [vmem:[#allocation6 + $0x130] sm:$0xff]   ;;  %v1132_v3 = vld [vmem:[#allocation6 + $0x1f8] sm:$0xff]   ;;  %v780_v21 = vmul.f32 %v771_v14, %v771_v14 }
  0x4b   :  { %v1130_v1 = vld [vmem:[#allocation6 + $0x1b0] sm:$0xff]   ;;  %v1133_v4 = vld [vmem:[#allocation6 + $0x138] sm:$0xff]  }
  0x4c   :  { %982 = vmatpush3.bf16.msra.mxu0 %v1089_v22  ;;  %v1134_v5 = vld [vmem:[#allocation6 + $0x1b8] sm:$0xff]   ;;  %v66_v6 = vld [vmem:[#allocation4 + $0x10] sm:$0xff]  ;;  %v781_v22 = vmul.f32 %v772_v15, %v772_v15 }
  0x4d   :  { %1004 = vmatpush3.bf16.msra.mxu1 %v1090_v23  ;;  %983 = vmatprep.subr.bf16.mxu0 %v1091_v24  ;;  %v67_v7 = vld [vmem:[#allocation4 + $0x18] sm:$0xff]  ;;  %v903_v8 = vcombine.high %v66_v6, %v66_v6  ;;  %v902_v10 = vcombine.low %v66_v6, %v66_v6  ;;  %v793_v23 = vrot.slane %v788_v18, %v792_v16  ;;  %v775_v32 = vunpack.c.l.bf16 %v66_v6 }
  0x4e   :  { %1005 = vmatprep.subr.bf16.mxu1 %v1092_v25  ;;  %v905_v9 = vcombine.high %v67_v7, %v67_v7  ;;  %v904_v11 = vcombine.low %v67_v7, %v67_v7  ;;  %v797_v24 = vrot.slane %v788_v18, %v796_v17  ;;  %v774_v25 = vunpack.c.h.bf16 %v1287_v33 }
  0x50   :  { %984 = vmatpush3.bf16.msra.mxu0 %v1093_v26  ;;  %v782_v26 = vmul.f32 %v773_v19, %v773_v19 }
  0x51   :  { %1006 = vmatpush3.bf16.msra.mxu1 %v1094_v27  ;;  %985 = vmatprep.subr.bf16.mxu0 %v1095_v28  ;;  %v801_v27 = vrot.slane %v788_v18, %v800_v20  ;;  %v830_v28 = vmul.f32 %v793_v23, %v780_v21  ;;  %v868_v23 = vand.u32 127, %v790_v12 }
  0x52   :  { %1007 = vmatprep.subr.bf16.mxu1 %v1096_v29  ;;  %v831_v29 = vmul.f32 %v797_v24, %v781_v22 }
  0x53   :  { %v832_v34 = vmul.f32 %v801_v27, %v782_v26  ;;  %vm869_vm1 = vcmp.lt.s32.totalorder %v868_v23, 16 }
  0x54   :  { %986 = vmatpush3.bf16.msra.mxu0 %v1097_v30  ;;  %v804_v30 = vsub.s32 3, %v791_v13 }
  0x55   :  { %1008 = vmatpush3.bf16.msra.mxu1 %v1098_v31  ;;  %1015 = vmatprep.subr.bf16.mxu0 %v1103_v35  ;;  %v783_v31 = vmul.f32 %v774_v25, %v774_v25 }
  0x56   :  { %1037 = vmatprep.subr.bf16.mxu1 %v1104_v37  ;;  %v805_v35 = vrot.slane %v788_v18, %v804_v30  ;;  %v838_v37 = vadd.f32 %v831_v29, %v830_v28 }
  0x57   :  { %642 = vmatmul.mubr.bf16.vlgmr.msra.gmra.mrb[0].mxu0 %v898_v38  ;;  %v776_v38 = vunpack.c.h.bf16 %v66_v6 }
  0x58   :  { %682 = vmatmul.mubr.bf16.vlgmr.msra.gmra.mrb[0].mxu1 %v900_v40  ;;  %1016 = vmatpush3.bf16.msra.mxu0 %v1105_v39  ;;  %v784_v39 = vmul.f32 %v775_v32, %v775_v32  ;;  %v809_v40 = vrot.slane %v788_v18, %v808_v36 }
  0x59   :  { %1038 = vmatpush3.bf16.msra.mxu1 %v1106_v41  ;;  %1017 = vmatprep.subr.bf16.mxu0 %v1107_v42  ;;  %v812_v41 = vsub.s32 5, %v791_v13  ;;  %v833_v42 = vmul.f32 %v805_v35, %v783_v31 }
  0x5a   :  { %1039 = vmatprep.subr.bf16.mxu1 %v1108_v43  ;;  %721 = vmatprep.mubr.bf16.mxu0 %v903_v8  ;;  %v839_v43 = vadd.f32 %v838_v37, %v832_v34 }
  0x5b   :  { %761 = vmatprep.mubr.bf16.mxu1 %v905_v9  ;;  %v813_v33 = vrot.slane %v788_v18, %v812_v41 }
  0x5c   :  { %1018 = vmatpush3.bf16.msra.mxu0 %v1109_v44  ;;  %v777_v44 = vunpack.c.l.bf16 %v67_v7 }
  0x5d   :  { %1040 = vmatpush3.bf16.msra.mxu1 %v1110_v45  ;;  %1019 = vmatprep.subr.bf16.mxu0 %v1111_v46  ;;  %v785_v45 = vmul.f32 %v776_v38, %v776_v38  ;;  %v816_v46 = vsub.s32 6, %v791_v13 }
  0x5e   :  { %1041 = vmatprep.subr.bf16.mxu1 %v1112_v47  ;;  %v834_v47 = vmul.f32 %v809_v40, %v784_v39 }
  0x60   :  { %1020 = vmatpush3.bf16.msra.mxu0 %v1113_v48  ;;  %v840_v48 = vadd.f32 %v839_v43, %v833_v42 }
  0x61   :  { %1042 = vmatpush3.bf16.msra.mxu1 %v1114_v49  ;;  %1021 = vmatprep.subr.bf16.mxu0 %v1115_v50  ;;  %v778_v49 = vunpack.c.h.bf16 %v67_v7  ;;  %v786_v50 = vmul.f32 %v777_v44, %v777_v44 }
  0x62   :  { %1043 = vmatprep.subr.bf16.mxu1 %v1116_v51  ;;  %v817_v51 = vrot.slane %v788_v18, %v816_v46 }
  0x64   :  { %1022 = vmatpush3.bf16.msra.mxu0 %v1117_v52  ;;  %v820_v52 = vsub.s32 7, %v791_v13 }
  0x65   :  { %1044 = vmatpush3.bf16.msra.mxu1 %v1118_v53  ;;  %1023 = vmatprep.subr.bf16.mxu0 %v1119_v54  ;;  %v835_v53 = vmul.f32 %v813_v33, %v785_v45  ;;  %v841_v54 = vadd.f32 %v840_v48, %v834_v47 }
  0x66   :  { %1045 = vmatprep.subr.bf16.mxu1 %v1120_v55  ;;  %v787_v55 = vmul.f32 %v778_v49, %v778_v49 }
  0x68   :  { %1024 = vmatpush3.bf16.msra.mxu0 %v1121_v56  ;;  %v821_v56 = vrot.slane %v788_v18, %v820_v52 }
  0x69   :  { %1046 = vmatpush3.bf16.msra.mxu1 %v1122_v57  ;;  %1025 = vmatprep.subr.bf16.mxu0 %v1123_v58  ;;  %v836_v57 = vmul.f32 %v817_v51, %v786_v50  ;;  %v842_v58 = vadd.f32 %v841_v54, %v835_v53 }
  0x6a   :  { %1047 = vmatprep.subr.bf16.mxu1 %v1124_v59  ;;  %v837_v59 = vmul.f32 %v821_v56, %v787_v55 }
  0x6c   :  { %1026 = vmatpush3.bf16.msra.mxu0 %v1125_v60  ;;  %v843_v60 = vadd.f32 %v842_v58, %v836_v57 }
  0x6d   :  { %1048 = vmatpush3.bf16.msra.mxu1 %v1126_v61  ;;  %1027 = vmatprep.subr.bf16.mxu0 %v1127_v62  ;;  %v970_v62 = vld [vmem:[%s1319_s3] ss:$0 sm:$0xff]  ;;  %s1218_s3 = smov 112  }
  0x6e   :  { %1049 = vmatprep.subr.bf16.mxu1 %v1128_v63  ;;  %v844_v61 = vadd.f32 %v843_v60, %v837_v59  ;;  %875 = vrot.lane.b32.xlu1 %v970_v62, %s1216_s30  ;;  %v1217_v63 = vmov 0.0  }
  0x6f   :  { %63 = vst.msk [vmem:[#allocation3] sm:$0xff] %vm62_vm0, %v1217_v63 }
  0x70   :  { %1028 = vmatpush3.bf16.msra.mxu0 %v1129_v0  ;;  %845 = vadd.xlane.f32.xlu0 %v844_v61 }
  0x71   :  { %1050 = vmatpush3.bf16.msra.mxu1 %v1130_v1  ;;  %1029 = vmatprep.subr.bf16.mxu0 %v1131_v2 }
  0x72   :  { %1051 = vmatprep.subr.bf16.mxu1 %v1132_v3 }
  0x74   :  { %1030 = vmatpush3.bf16.msra.mxu0 %v1133_v4 }
  0x75   :  { %1052 = vmatpush3.bf16.msra.mxu1 %v1134_v5 }
  0x76   :  { %v779_v28 = vld [vmem:[#allocation3] sm:$0xff] }
  0x77   :  { %722 = vmatmul.mubr.bf16.vlgmr.msra.gmra.mrb[4].mxu0 %v902_v10 }
  0x78   :  { %762 = vmatmul.mubr.bf16.vlgmr.msra.gmra.mrb[4].mxu1 %v904_v11 }
  0xe0   :  { %v876_v31 = vpop.permute.xlu1 %875 }
  0xfd   :  { %v846_v29 = vpop.xlane.xlu0 %845 }
  0xfe   :  { %v847_v30 = vadd.f32 %v846_v29, %v779_v28 }
 0x100   :  { %849 = vst.msk [vmem:[#allocation3] sm:$0xff] %vm62_vm0, %v847_v30 }
 0x107   :  { %v874_v12 = vld [vmem:[#allocation3] sm:$0xff] }
 0x108   :  { %v878_v32 = vadd.f32 %v876_v31, %v874_v12 }
 0x12a   :  { %v987_v0 = vpop.f32.mrb[0].mxu0 }
 0x12b   :  { %v1009_v1 = vpop.f32.mrb[0].mxu1  ;;  %v988_v2 = vpop.f32.mrb[1].mxu0 }
 0x12c   :  { %v989_v3 = vadd.f32 %v988_v2, %v987_v0  ;;  %v1010_v4 = vpop.f32.mrb[1].mxu1  ;;  %v990_v5 = vpop.f32.mrb[2].mxu0 }
 0x12d   :  { %v1011_v6 = vadd.f32 %v1010_v4, %v1009_v1  ;;  %v1012_v7 = vpop.f32.mrb[2].mxu1  ;;  %v991_v8 = vpop.f32.mrb[3].mxu0 }
 0x12e   :  { %v1013_v9 = vpop.f32.mrb[3].mxu1 }
 0x12f   :  { %v684_v10 = vadd.f32 %v1011_v6, %v989_v3 }
 0x14a   :  { %v1031_v11 = vpop.f32.mrb[4].mxu0 }
 0x14b   :  { %v1053_v13 = vpop.f32.mrb[4].mxu1  ;;  %v1032_v14 = vpop.f32.mrb[5].mxu0 }
 0x14c   :  { %v1054_v15 = vpop.f32.mrb[5].mxu1  ;;  %v1033_v16 = vadd.f32 %v1032_v14, %v1031_v11  ;;  %v1034_v17 = vpop.f32.mrb[6].mxu0 }
 0x14d   :  { %v1055_v18 = vadd.f32 %v1054_v15, %v1053_v13  ;;  %v1056_v19 = vpop.f32.mrb[6].mxu1  ;;  %v1035_v20 = vpop.f32.mrb[7].mxu0 }
 0x14e   :  { %v724_v21 = vadd.f32 %v1033_v16, %v684_v10  ;;  %v1057_v22 = vpop.f32.mrb[7].mxu1 }
 0x150   :  { %v764_v24 = vadd.f32 %v1055_v18, %v724_v21 }
 0x152   :  { %v861_v25 = vadd.f32 %v970_v62, %v764_v24 }
 0x154   :  { %863 = vrot.lane.b32.xlu1 %v861_v25, %s1218_s3  ;;  %v870_v26 = vmul.f32 %v861_v25, %v861_v25 }
 0x156   :  { %v871_v27 = vsel %vm869_vm1, %v870_v26, 0.0 }
 0x157   :  { %872 = vadd.xlane.f32.xlu0 %v871_v27 }
 0x1c6   :  { %v864_v34 = vpop.permute.xlu1 %863 }
 0x1c7   :  { %866 = vst.msk [vmem:[%s1320_s4] sm:$0xff] %vm62_vm0, %v864_v34 }
 0x1e4   :  { %v873_v35 = vpop.xlane.xlu0 %872 }
 0x1e5   :  { %v879_v36 = vadd.f32 %v878_v32, %v873_v35 }
 0x1e7   :  { %1139 = vrsqrt.f32 %v879_v36  ;;  %vm882_vm2 = vcmp.eq.f32.partialorder %v879_v36, inf  ;;  %v885_v39 = vand.u32 2147483648, %v879_v36  ;;  %vm884_vm3 = vcmp.eq.f32.partialorder %v879_v36, 0.0 }
 0x1f1   :  { %v1140_v37 = vpop.eup %1139 }
 0x1f2   :  { %v881_v38 = vmul.f32 %v1140_v37, %v879_v36 }
 0x1f4   :  { %v883_v40 = vsel %vm882_vm2, %v879_v36, %v881_v38 }
 0x1f5   :  { %v886_v41 = vsel %vm884_vm3, %v885_v39, %v883_v40 }
 0x1f6   :  { %887 = vst.msk [vmem:[%s1321_s5] sm:$0xff] %vm62_vm0, %v886_v41 }
 0x1f7   :  { %896 = vsyncpa [#allocation5], 1 }
 0x1f8   :  { %897 = vsyncpa [#allocation7], 1 }

</bundles_post_ra>
